<compile_context>
chip_gen: v7x
topology: tpu7x:2x2x1
jax: 0.10.0
libtpu: 0.0.40
codegen_flags: <defaults>
</compile_context>

<pallas_src>
import functools

import jax
import jax.numpy as jnp
from jax.experimental import pallas as pl
from jax.experimental.pallas import tpu as pltpu

_LANES = 128


def _normal_nll_kernel(x_ref, mu_ref, var_ref, out_ref, *, mask_last, valid_rows_last):
    """One (block_rows, 128) tile: elementwise 2*logli + row-axis partial reduction.

    x_ref/mu_ref/var_ref: (block_rows, 128) VMEM tiles (any float dtype, upcast here).
    out_ref:              (1, 1, 128) f32 partial sums for this grid step.
    """
    x = x_ref[...].astype(jnp.float32)
    mu = mu_ref[...].astype(jnp.float32)
    var = var_ref[...].astype(jnp.float32)

    diff = x - mu
    # Reference: 0.5*log(2*pi*var + 1e-6) + diff^2 / (2*var + 1e-6).
    # The 0.5 is factored out (applied once to the reduced sum in the wrapper):
    #   2*logli = log(2*pi*var + 1e-6) + diff^2 / (var + 5e-7)
    logli2 = jnp.log(2.0 * jnp.pi * var + 1e-6) + (diff * diff) / (var + 5e-7)

    def _store(vals):
        out_ref[...] = jnp.sum(vals, axis=0, keepdims=True)[None]

    if mask_last:
        i = pl.program_id(0)
        last = pl.num_programs(0) - 1

        @pl.when(i != last)
        def _():
            _store(logli2)

        @pl.when(i == last)
        def _():
            # Boundary block: rows >= valid_rows_last are Pallas' clamped-copy
            # garbage (possibly NaN); the select drops them exactly.
            rows = jax.lax.broadcasted_iota(jnp.int32, logli2.shape, 0)
            _store(jnp.where(rows < valid_rows_last, logli2, 0.0))
    else:
        _store(logli2)


def normal_nll_loss(x, mu, var, *, reduction="mean", tile_rows=4096):
    """Pallas implementation of NormalNLLLoss.forward for 2-D (B, C) inputs."""
    assert x.shape == mu.shape == var.shape
    assert x.ndim == 2, "expected (batch, code_dim) inputs"
    assert tile_rows % 16 == 0, "tile_rows must be a multiple of 16"

    B, C = x.shape
    N = B * C

    # 0.5 from the logli formula is folded into the final scale.
    if reduction == "mean":
        scale = 0.5 / float(B)  # sum over dim 1 then mean over batch == total / B
    elif reduction == "sum":
        scale = 0.5
    else:
        raise ValueError(f"unsupported reduction: {reduction}")

    R = N // _LANES   # full 128-wide lane rows streamed through the kernel
    rem = N % _LANES  # <128 trailing elements handled in plain XLA (tiny)

    xf = x.reshape(-1)
    muf = mu.reshape(-1)
    varf = var.reshape(-1)

    tail = jnp.float32(0.0)
    if rem:
        xt = xf[N - rem:].astype(jnp.float32)
        mt = muf[N - rem:].astype(jnp.float32)
        vt = varf[N - rem:].astype(jnp.float32)
        dt = xt - mt
        tail = jnp.sum(jnp.log(2.0 * jnp.pi * vt + 1e-6) + dt * dt / (vt + 5e-7))

    if R == 0:
        # TODO(synk): inputs with fewer than 128 elements never reach the kernel
        # (pure-XLA tail path); at that size dispatch overhead dominates anyway.
        return tail * scale

    bulk = R * _LANES

    def _view(a):
        if rem:                      # rare path; common case is a free reshape
            a = a[:bulk]
        return a.reshape(R, _LANES)  # contiguous -> bitcast, no copy, no astype

    x2, mu2, var2 = _view(xf), _view(muf), _view(varf)

    # --- Tiling ---------------------------------------------------------------
    if R <= tile_rows:
        block_rows = R               # full-extent block: no masking, single step
        num_tiles = 1
        mask_last = False
        valid_rows_last = R
    else:
        block_rows = tile_rows       # 4096 x 128 f32 = 2 MiB per input per step
        num_tiles = pl.cdiv(R, block_rows)
        valid_rows_last = R - (num_tiles - 1) * block_rows
        mask_last = valid_rows_last != block_rows

    kernel = functools.partial(
        _normal_nll_kernel, mask_last=mask_last, valid_rows_last=valid_rows_last
    )

    in_spec = pl.BlockSpec((block_rows, _LANES), lambda i: (i, 0))
    out_spec = pl.BlockSpec((1, 1, _LANES), lambda i: (i, 0, 0))

    partials = pl.pallas_call(
        kernel,
        out_shape=jax.ShapeDtypeStruct((num_tiles, 1, _LANES), jnp.float32),
        grid_spec=pltpu.PrefetchScalarGridSpec(
            num_scalar_prefetch=0,
            grid=(num_tiles,),
            in_specs=[in_spec, in_spec, in_spec],
            out_specs=out_spec,
        ),
        compiler_params=pltpu.CompilerParams(
            # Independent per-tile partials -> parallel grid axis.  On v7x,
            # escalate to pltpu.CORE_PARALLEL if xprof shows a single-TC run.
            dimension_semantics=("parallel",),
            # 3 inputs x 2 buffers x 2 MiB ~= 12 MiB; leave headroom on all gens.
            vmem_limit_bytes=32 * 1024 * 1024,
        ),
    )(x2, mu2, var2)

    # Tiny final reduction (num_tiles * 128 f32) + 0.5/B (or 0.5) scale in XLA.
    return (jnp.sum(partials) + tail) * scale


def _reference(x, mu, var, reduction="mean"):
    logli = 0.5 * jnp.log(2.0 * jnp.pi * var + 1e-6) + (x - mu) ** 2 / (2.0 * var + 1e-6)
    if reduction == "mean":
        return logli.sum(1).mean()
    return logli.sum()


if __name__ == "__main__":
    key = jax.random.PRNGKey(0)
    k1, k2, k3 = jax.random.split(key, 3)

    # InfoGAN-like (batch, continuous-code-dim): zero-copy single-tile path.
    B, C = 16, 32
    x = jax.random.normal(k1, (B, C), dtype=jnp.float32)
    mu = jax.random.normal(k2, (B, C), dtype=jnp.float32)
    var = jnp.exp(jax.random.normal(k3, (B, C), dtype=jnp.float32) * 0.5)  # var > 0

    nll_mean = jax.block_until_ready(normal_nll_loss(x, mu, var, reduction="mean"))
    nll_sum = jax.block_until_ready(normal_nll_loss(x, mu, var, reduction="sum"))
    ref_mean = _reference(x, mu, var, "mean")
    ref_sum = _reference(x, mu, var, "sum")
    assert jnp.allclose(nll_mean, ref_mean, rtol=1e-5, atol=1e-5), (nll_mean, ref_mean)
    assert jnp.allclose(nll_sum, ref_sum, rtol=1e-5, atol=1e-4), (nll_sum, ref_sum)

    # Multi-tile path with a partial (pl.when-masked) boundary block:
    # R = 400 rows, tile_rows = 64 -> 7 tiles, last tile has 16 valid rows.
    B2, C2 = 40, 1280
    x2 = jax.random.normal(k1, (B2, C2), dtype=jnp.float32)
    mu2 = jax.random.normal(k2, (B2, C2), dtype=jnp.float32)
    var2 = jnp.exp(jax.random.normal(k3, (B2, C2), dtype=jnp.float32) * 0.5)
    nll2 = jax.block_until_ready(
        normal_nll_loss(x2, mu2, var2, reduction="mean", tile_rows=64)
    )
    ref2 = _reference(x2, mu2, var2, "mean")
    assert jnp.allclose(nll2, ref2, rtol=5e-5, atol=1e-2), (nll2, ref2)

    # N not a multiple of 128: bulk through the kernel, <128-element tail in XLA.
    B3, C3 = 10, 13
    x3 = jax.random.normal(k1, (B3, C3), dtype=jnp.float32)
    mu3 = jax.random.normal(k2, (B3, C3), dtype=jnp.float32)
    var3 = jnp.exp(jax.random.normal(k3, (B3, C3), dtype=jnp.float32) * 0.5)
    nll3 = jax.block_until_ready(normal_nll_loss(x3, mu3, var3, reduction="sum"))
    ref3 = _reference(x3, mu3, var3, "sum")
    assert jnp.allclose(nll3, ref3, rtol=1e-5, atol=1e-4), (nll3, ref3)

    # bf16 inputs stream through the kernel in bf16 (half the HBM bytes) and are
    # upcast to f32 inside; compare against the f32 reference on the same values.
    xb = x.astype(jnp.bfloat16)
    mub = mu.astype(jnp.bfloat16)
    varb = var.astype(jnp.bfloat16)
    nll_b = jax.block_until_ready(normal_nll_loss(xb, mub, varb, reduction="mean"))
    ref_b = _reference(
        xb.astype(jnp.float32), mub.astype(jnp.float32), varb.astype(jnp.float32), "mean"
    )
    assert jnp.allclose(nll_b, ref_b, rtol=1e-5, atol=1e-4), (nll_b, ref_b)

    print("KERNEL_OK")
</pallas_src>

<mosaic_0001>
module attributes {stable_mosaic.version = 11 : i64} {
  func.func @_normal_nll_kernel(%arg0: i32, %arg1: memref<4x128xf32, #tpu.memory_space<vmem>>, %arg2: memref<4x128xf32, #tpu.memory_space<vmem>>, %arg3: memref<4x128xf32, #tpu.memory_space<vmem>>, %arg4: memref<1x1x128xf32, #tpu.memory_space<vmem>>) attributes {dimension_semantics = [#tpu.dimension_semantics<parallel>], iteration_bounds = array<i64: 1>, scalar_prefetch = 0 : i64, scratch_operands = 0 : i64, tpu.core_type = #tpu.core_type<tc>, window_params = [{transform_indices = @transform_0, window_bounds = array<i64: 4, 128>}, {transform_indices = @transform_1, window_bounds = array<i64: 4, 128>}, {transform_indices = @transform_2, window_bounds = array<i64: 4, 128>}, {transform_indices = @transform_3, window_bounds = array<i64: 1, 1, 128>}]} {
    %c0 = arith.constant 0 : index
    %c0_0 = arith.constant 0 : index
    %0 = vector.load %arg1[%c0, %c0_0] : memref<4x128xf32, #tpu.memory_space<vmem>>, vector<4x128xf32>
    %c0_1 = arith.constant 0 : index
    %c0_2 = arith.constant 0 : index
    %1 = vector.load %arg2[%c0_1, %c0_2] : memref<4x128xf32, #tpu.memory_space<vmem>>, vector<4x128xf32>
    %c0_3 = arith.constant 0 : index
    %c0_4 = arith.constant 0 : index
    %2 = vector.load %arg3[%c0_3, %c0_4] : memref<4x128xf32, #tpu.memory_space<vmem>>, vector<4x128xf32>
    %3 = arith.subf %0, %1 : vector<4x128xf32>
    %cst = arith.constant 6.28318548 : f32
    %4 = vector.broadcast %cst : f32 to vector<4x128xf32>
    %5 = arith.mulf %4, %2 : vector<4x128xf32>
    %cst_5 = arith.constant 9.99999997E-7 : f32
    %6 = vector.broadcast %cst_5 : f32 to vector<4x128xf32>
    %7 = arith.addf %5, %6 : vector<4x128xf32>
    %8 = math.log %7 : vector<4x128xf32>
    %9 = arith.mulf %3, %3 : vector<4x128xf32>
    %cst_6 = arith.constant 5.000000e-07 : f32
    %10 = vector.broadcast %cst_6 : f32 to vector<4x128xf32>
    %11 = arith.addf %2, %10 : vector<4x128xf32>
    %12 = arith.divf %9, %11 : vector<4x128xf32>
    %13 = arith.addf %8, %12 : vector<4x128xf32>
    %cst_7 = arith.constant dense<0.000000e+00> : vector<128xf32>
    %14 = vector.multi_reduction <add>, %13, %cst_7 [0] : vector<4x128xf32> to vector<128xf32>
    %15 = vector.shape_cast %14 : vector<128xf32> to vector<1x128xf32>
    %16 = vector.shape_cast %15 : vector<1x128xf32> to vector<1x1x128xf32>
    %c0_8 = arith.constant 0 : index
    %c0_9 = arith.constant 0 : index
    %c0_10 = arith.constant 0 : index
    %17 = vector.load %arg4[%c0_8, %c0_9, %c0_10] : memref<1x1x128xf32, #tpu.memory_space<vmem>>, vector<1x1x128xf32>
    tpu.vector_store %arg4[%c0_8, %c0_9, %c0_10], %16 {strides = array<i32>} : memref<1x1x128xf32, #tpu.memory_space<vmem>>, vector<1x1x128xf32>,
    return
  }
  func.func @transform_0(%arg0: i32) -> (i32, i32) {
    %c0_i32 = arith.constant 0 : i32
    %c0_i32_0 = arith.constant 0 : i32
    return %arg0, %c0_i32 : i32, i32
  }
  func.func @transform_1(%arg0: i32) -> (i32, i32) {
    %c0_i32 = arith.constant 0 : i32
    %c0_i32_0 = arith.constant 0 : i32
    return %arg0, %c0_i32 : i32, i32
  }
  func.func @transform_2(%arg0: i32) -> (i32, i32) {
    %c0_i32 = arith.constant 0 : i32
    %c0_i32_0 = arith.constant 0 : i32
    return %arg0, %c0_i32 : i32, i32
  }
  func.func @transform_3(%arg0: i32) -> (i32, i32, i32) {
    %c0_i32 = arith.constant 0 : i32
    %c0_i32_0 = arith.constant 0 : i32
    %c0_i32_1 = arith.constant 0 : i32
    return %arg0, %c0_i32, %c0_i32_0 : i32, i32, i32
  }
}

</mosaic_0001>

<bundles_post_ra>
// kernel: tpu_custom_call.1
= control target key start
LH: loop header
LB: loop body
LE: loop exit
PB: predicated region body
PF: predicated region fallthrough
CT: control target
= control target key end

     0   :  { %8 = vsyncpa [#allocation3], 0  ;;  %s218_s0 = inlined_call_operand.hbm [shape: f32[4,128], index: 0, kind: input, shape index: {}]   ;;  %s219_s1 = inlined_call_operand.hbm [shape: f32[4,128], index: 1, kind: input, shape index: {}]   ;;  %s220_s2 = inlined_call_operand.vmem [shape: f32[4,128], index: 2, kind: input, shape index: {}]   ;;  %s221_s3 = inlined_call_operand.hbm [shape: f32[1,1,128], index: 3, kind: output, shape index: {}]  }
   0x1   :  { %9 = vsyncpa [#allocation6], 0 }
   0x2   :  { %10 = vsyncpa [#allocation4], 0  ;;  %s156_s12 = smov [#allocation2]   ;;  %s157_s14 = smov [#allocation5]  }
   0x3   :  { %s17_s13 = sshll.u32 %s156_s12, 4  ;;  %s27_s15 = sshll.u32 %s157_s14, 4  ;;  %s18_s13 = int_to_ptr.vmem [resolvable:$true] %s17_s13  ;;  %s28_s15 = int_to_ptr.vmem [resolvable:$true] %s27_s15 }
   0x4   :  { %s84_s18 = scalar_lea.hbm %s218_s0, 64 }
   0x5   :  { %p85_p0 = scmp.ne.s32.totalorder %s218_s0, %s84_s18  ;;  %p88_p1 = scmp.lt.u32.totalorder %s84_s18, %s218_s0 }
   0x7   :  { %p90_p2 = pnand %p88_p1, %p85_p0 }
   0x9   :  { %93 = shalt.err (!%p90_p2)
}
   0xa   :  { %s94_s23 = scalar_lea.vmem %s18_s13, 64  ;;  %p99_p4 = scmp.lt.s32.totalorder %s18_s13, %s18_s13 }
   0xb   :  { %p95_p3 = scmp.ne.s32.totalorder %s18_s13, %s94_s23  ;;  %p100_p5 = scmp.lt.s32.totalorder %s94_s23, %s94_s23 }
   0xd   :  { %p101_p6 = por %p100_p5, %p99_p4 }
   0xf   :  { %p102_p7 = pnand %p101_p6, %p95_p3 }
  0x11   :  { %105 = shalt.err (!%p102_p7)
}
  0x12   :  { %20 = dma.hbm_to_vmem [thread:$0]  %s218_s0, 64, %s18_s13, [#allocation3]  }
  0x13   :  { %s106_s28 = scalar_lea.hbm %s219_s1, 64 }
  0x14   :  { %p107_p8 = scmp.ne.s32.totalorder %s219_s1, %s106_s28  ;;  %p110_p9 = scmp.lt.u32.totalorder %s106_s28, %s219_s1 }
  0x16   :  { %p112_p10 = pnand %p110_p9, %p107_p8 }
  0x18   :  { %115 = shalt.err (!%p112_p10)
}
  0x19   :  { %s116_s6 = scalar_lea.vmem %s28_s15, 64  ;;  %p121_p12 = scmp.lt.s32.totalorder %s28_s15, %s28_s15 }
  0x1a   :  { %p117_p11 = scmp.ne.s32.totalorder %s28_s15, %s116_s6  ;;  %p122_p13 = scmp.lt.s32.totalorder %s116_s6, %s116_s6 }
  0x1c   :  { %p123_p0 = por %p122_p13, %p121_p12 }
  0x1e   :  { %p124_p1 = pnand %p123_p0, %p117_p11 }
  0x20   :  { %127 = shalt.err (!%p124_p1)
}
  0x21   :  { %30 = dma.hbm_to_vmem [thread:$0]  %s219_s1, 64, %s28_s15, [#allocation6]  }
  0x22   :  { %150 = dma.done.wait [#allocation3], 64  }
  0x23   :  { %151 = vsyncadd [#allocation3], 4294967232 }
  0x24   :  { %152 = dma.done.wait [#allocation6], 64  }
  0x25   :  { %153 = vsyncadd [#allocation6], 4294967232  ;;  %v41_v0 = vld [vmem:[%s220_s2] sm:$0xf]  ;;  %v40_v4 = vld [vmem:[#allocation5] sm:$0xf] }
  0x26   :  { %v43_v1 = vmul.f32 6.2831855, %v41_v0  ;;  %v48_v2 = vadd.f32 5e-07, %v41_v0  ;;  %v39_v3 = vld [vmem:[#allocation2] sm:$0xf] }
  0x27   :  { %v42_v6 = vsub.f32 %v39_v3, %v40_v4  ;;  %vm52_vm0 = vcmask 1043456   ;;  %s158_s1 = smov [#allocation7]  }
  0x28   :  { %v44_v5 = vadd.f32 1e-06, %v43_v1  ;;  %80 = vrcp.f32 %v48_v2  ;;  %s67_s2 = sshll.u32 %s158_s1, 4  ;;  %s68_s2 = int_to_ptr.vmem [resolvable:$true] %s67_s2 }
  0x29   :  { %v47_v7 = vmul.f32 %v42_v6, %v42_v6  ;;  %s128_s10 = scalar_lea.vmem %s68_s2, 16  ;;  %s132_s11 = scalar_lea.vmem %s68_s2, 32 }
  0x2a   :  { %82 = vlog2.f32 %v44_v5  ;;  %p129_p2 = scmp.ne.s32.totalorder %s68_s2, %s128_s10  ;;  %p133_p3 = scmp.lt.s32.totalorder %s68_s2, %s68_s2 }
  0x2b   :  { %p134_p4 = scmp.lt.s32.totalorder %s132_s11, %s128_s10 }
  0x2d   :  { %p135_p5 = por %p134_p4, %p133_p3 }
  0x2f   :  { %p136_p6 = pnand %p135_p5, %p129_p2 }
  0x32   :  { %v81_v8 = vpop.eup %80 }
  0x33   :  { %v50_v9 = vmul.f32 %v81_v8, %v47_v7 }
  0x34   :  { %v83_v10 = vpop.eup %82 }
  0x35   :  { %v46_v11 = vmul.f32 0.6931472, %v83_v10 }
  0x37   :  { %v51_v12 = vadd.f32 %v50_v9, %v46_v11 }
  0x39   :  { %v53_v13 = vsel %vm52_vm0, %v51_v12, 0.0 }
  0x3a   :  { %v54_v14 = vrot.slane %v53_v13, 4 }
  0x3c   :  { %v55_v15 = vadd.f32 %v54_v14, %v53_v13 }
  0x3e   :  { %v56_v16 = vrot.slane %v55_v15, 2 }
  0x40   :  { %v57_v17 = vadd.f32 %v56_v16, %v55_v15 }
  0x42   :  { %v58_v18 = vrot.slane %v57_v17, 1 }
  0x44   :  { %v59_v19 = vadd.f32 %v58_v18, %v57_v17 }
  0x46   :  { %60 = vst [vmem:[#allocation7] sm:$0x1] %v59_v19 }
  0x47   :  { %139 = shalt.err (!%p136_p6)
}
  0x48   :  { %s140_s14 = scalar_lea.hbm %s221_s3, 16 }
  0x49   :  { %p141_p7 = scmp.ne.s32.totalorder %s221_s3, %s140_s14  ;;  %p144_p8 = scmp.lt.u32.totalorder %s140_s14, %s221_s3 }
  0x4b   :  { %p146_p9 = pnand %p144_p8, %p141_p7 }
  0x4d   :  { %149 = shalt.err (!%p146_p9)
}
  0x4e   :  { %70 = dma.vmem_to_hbm [thread:$0]  %s68_s2, 16, %s221_s3, [#allocation4]  }
  0x4f   :  { %154 = dma.done.wait [#allocation4], 16  }
  0x50   :  { %155 = vsyncadd [#allocation4], 4294967280 }
  0x51   :  { %74 = vsyncpa [#allocation3], 1 }
  0x52   :  { %75 = vsyncpa [#allocation6], 1 }
  0x53   :  { %76 = vsyncpa [#allocation4], 1 }

</bundles_post_ra>
